<compile_context>
chip_gen: v7x
topology: tpu7x:2x2x1
jax: 0.10.0
libtpu: 0.0.40
codegen_flags: <defaults>
</compile_context>

<pallas_src>
import jax
import jax.numpy as jnp
import numpy as np
from jax.experimental import pallas as pl
from jax.experimental.pallas import tpu as pltpu


def _round_up(x, m):
    return ((x + m - 1) // m) * m


def critic_kernel(x_ref, w1_ref, b1_ref, w2r_ref, b2_ref, out_ref):
    # fc_hidden: (TILE_B, D) @ (D, H) on the MXU, f32 accumulation.
    h = jnp.dot(x_ref[...], w1_ref[...], preferred_element_type=jnp.float32)
    # bias + ReLU on the VPU, in f32 (v5e has no bf16 VPU; keep elementwise f32).
    h = jnp.maximum(h + b1_ref[...], 0.0)                        # (TILE_B, H)
    # fc_value (H -> 1): VPU multiply + lane reduction instead of an N=1 MXU
    # matmul; b2 comes from SMEM as a scalar.
    v = jnp.sum(h * w2r_ref[...], axis=-1) + b2_ref[0, 0]        # (TILE_B,)
    # Lane-dense store: one (1, TILE_B) row per grid step (unmasked vst).
    out_ref[...] = v.reshape(1, -1).astype(out_ref.dtype)


def critic_forward(x, w1, b1, w2, b2, *, tile_b=None, compute_dtype=None):
    """x: (B, D); w1: (D, H); b1: (1, H); w2: (H, 1); b2: (1, 1) -> (B, 1).

    compute_dtype: optional dtype (e.g. jnp.bfloat16) for x and W1 on the MXU
    path; accumulation, biases, ReLU and the H->1 projection stay f32.
    """
    B, D = x.shape
    H = w1.shape[1]

    if compute_dtype is not None:
        x = x.astype(compute_dtype)
        w1 = w1.astype(compute_dtype)

    # Second-layer weight as a (1, H) f32 row for broadcast multiply.
    w2_row = w2.reshape(1, H).astype(jnp.float32)
    b1 = b1.astype(jnp.float32)
    b2 = b2.astype(jnp.float32)

    # Batch tile: multiple of 128 so the (1, TILE_B) output row is lane-dense.
    if tile_b is None:
        tile_b = min(512, _round_up(max(B, 1), 128))
    tile_b = max(128, _round_up(tile_b, 128))
    n_tiles = pl.cdiv(B, tile_b)
    b_pad = n_tiles * tile_b
    if b_pad != B:
        x = jnp.pad(x, ((0, b_pad - B), (0, 0)))

    # NOTE: for very large input_dim, add a K-reduction grid axis (last,
    # "arbitrary") with an f32 VMEM accumulator instead of holding all of W1
    # resident — kept single-block here since D*H easily fits VMEM.
    out = pl.pallas_call(
        critic_kernel,
        out_shape=jax.ShapeDtypeStruct((n_tiles, tile_b), jnp.float32),
        grid=(n_tiles,),
        in_specs=[
            pl.BlockSpec((tile_b, D), lambda i: (i, 0)),            # x tile (streamed)
            pl.BlockSpec((D, H), lambda i: (0, 0)),                 # W1 (resident)
            pl.BlockSpec((1, H), lambda i: (0, 0)),                 # b1 (resident)
            pl.BlockSpec((1, H), lambda i: (0, 0)),                 # w2 row (resident)
            pl.BlockSpec(memory_space=pltpu.MemorySpace.SMEM),      # b2 scalar
        ],
        out_specs=pl.BlockSpec((1, tile_b), lambda i: (i, 0)),      # lane-dense row
        compiler_params=pltpu.CompilerParams(
            dimension_semantics=("parallel",)),
    )(x, w1, b1, w2_row, b2)

    # (n_tiles, tile_b) -> (B, 1); padded rows are dropped.
    return out.reshape(b_pad, 1)[:B]


def init_critic_params(key, input_dim, hidden_dim=128, output_dim=1):
    """Deterministic init mirroring the PyTorch module:
    xavier_normal_ on weights, Linear-default uniform on biases."""
    k1, k2, k3, k4 = jax.random.split(key, 4)

    def xavier_normal(k, fan_in, fan_out):
        std = float(np.sqrt(2.0 / (fan_in + fan_out)))
        # PyTorch weight shape is (out, in); we store transposed (in, out).
        return std * jax.random.normal(k, (fan_in, fan_out), dtype=jnp.float32)

    def bias_uniform(k, fan_in, size):
        bound = float(1.0 / np.sqrt(fan_in))
        return jax.random.uniform(k, (1, size), dtype=jnp.float32,
                                  minval=-bound, maxval=bound)

    w1 = xavier_normal(k1, input_dim, hidden_dim)     # (D, H)
    b1 = bias_uniform(k2, input_dim, hidden_dim)      # (1, H)
    w2 = xavier_normal(k3, hidden_dim, output_dim)    # (H, 1)
    b2 = bias_uniform(k4, hidden_dim, output_dim)     # (1, 1)
    return w1, b1, w2, b2


if __name__ == "__main__":
    key = jax.random.PRNGKey(0)
    kx, kp, kx2 = jax.random.split(key, 3)

    D, H, O = 32, 128, 1
    w1, b1, w2, b2 = init_critic_params(kp, D, H, O)

    def ref_fwd(x, cast=None):
        xx = x if cast is None else x.astype(cast)
        ww = w1 if cast is None else w1.astype(cast)
        h = jnp.maximum(
            jnp.dot(xx, ww, preferred_element_type=jnp.float32) + b1, 0.0)
        return h @ w2 + b2

    # 1) Small batch (single grid step), f32.
    x = jax.random.normal(kx, (8, D), dtype=jnp.float32)
    out = jax.block_until_ready(critic_forward(x, w1, b1, w2, b2))
    np.testing.assert_allclose(np.asarray(out), np.asarray(ref_fwd(x)),
                               rtol=1e-5, atol=1e-5)
    assert out.shape == (8, 1)

    # 2) Multi-tile batch (exercises the grid, padding, lane-dense writeback).
    x2 = jax.random.normal(kx2, (300, D), dtype=jnp.float32)
    out2 = jax.block_until_ready(critic_forward(x2, w1, b1, w2, b2, tile_b=128))
    np.testing.assert_allclose(np.asarray(out2), np.asarray(ref_fwd(x2)),
                               rtol=1e-5, atol=1e-5)
    assert out2.shape == (300, 1)

    # 3) bf16 x / W1 on the MXU (bandwidth path for v6e/v7x), f32 everywhere else.
    out3 = jax.block_until_ready(
        critic_forward(x2, w1, b1, w2, b2, tile_b=128,
                       compute_dtype=jnp.bfloat16))
    np.testing.assert_allclose(np.asarray(out3),
                               np.asarray(ref_fwd(x2, jnp.bfloat16)),
                               rtol=1e-3, atol=1e-3)

    print("KERNEL_OK")
</pallas_src>

<mosaic_0001>
module attributes {stable_mosaic.version = 11 : i64} {
  func.func @critic_kernel(%arg0: i32, %arg1: memref<128x32xf32, #tpu.memory_space<vmem>>, %arg2: memref<32x128xf32, #tpu.memory_space<vmem>>, %arg3: memref<1x128xf32, #tpu.memory_space<vmem>>, %arg4: memref<1x128xf32, #tpu.memory_space<vmem>>, %arg5: memref<1x1xf32, #tpu.memory_space<smem>>, %arg6: memref<1x128xf32, #tpu.memory_space<vmem>>) attributes {dimension_semantics = [#tpu.dimension_semantics<parallel>], iteration_bounds = array<i64: 1>, scalar_prefetch = 0 : i64, scratch_operands = 0 : i64, tpu.core_type = #tpu.core_type<tc>, window_params = [{transform_indices = @transform_0, window_bounds = array<i64: 128, 32>}, {pipeline_mode = #tpu.pipeline_mode<synchronous>, transform_indices = @transform_1, window_bounds = array<i64: 32, 128>}, {pipeline_mode = #tpu.pipeline_mode<synchronous>, transform_indices = @transform_2, window_bounds = array<i64: 1, 128>}, {pipeline_mode = #tpu.pipeline_mode<synchronous>, transform_indices = @transform_3, window_bounds = array<i64: 1, 128>}, {transform_indices = @transform_4, window_bounds = array<i64: 1, 1>}, {transform_indices = @transform_5, window_bounds = array<i64: 1, 128>}]} {
    %c0 = arith.constant 0 : index
    %c0_0 = arith.constant 0 : index
    %0 = vector.load %arg1[%c0, %c0_0] : memref<128x32xf32, #tpu.memory_space<vmem>>, vector<128x32xf32>
    %c0_1 = arith.constant 0 : index
    %c0_2 = arith.constant 0 : index
    %1 = vector.load %arg2[%c0_1, %c0_2] : memref<32x128xf32, #tpu.memory_space<vmem>>, vector<32x128xf32>
    %cst = arith.constant dense<0.000000e+00> : vector<128x128xf32>
    %2 = tpu.matmul %0, %1, %cst {dimension_numbers = #tpu.dot_dimension_numbers<[1], [0], [0], [1], [0, 0, 1, 1], [], []>} : vector<128x32xf32>, vector<32x128xf32>, vector<128x128xf32> -> vector<128x128xf32>
    %c0_3 = arith.constant 0 : index
    %c0_4 = arith.constant 0 : index
    %3 = vector.load %arg3[%c0_3, %c0_4] : memref<1x128xf32, #tpu.memory_space<vmem>>, vector<1x128xf32>
    %4 = vector.broadcast %3 : vector<1x128xf32> to vector<128x128xf32>
    %5 = arith.addf %2, %4 : vector<128x128xf32>
    %cst_5 = arith.constant 0.000000e+00 : f32
    %6 = vector.broadcast %cst_5 : f32 to vector<128x128xf32>
    %7 = arith.maximumf %5, %6 : vector<128x128xf32>
    %c0_6 = arith.constant 0 : index
    %c0_7 = arith.constant 0 : index
    %8 = vector.load %arg4[%c0_6, %c0_7] : memref<1x128xf32, #tpu.memory_space<vmem>>, vector<1x128xf32>
    %9 = vector.broadcast %8 : vector<1x128xf32> to vector<128x128xf32>
    %10 = arith.mulf %7, %9 : vector<128x128xf32>
    %cst_8 = arith.constant dense<0.000000e+00> : vector<128xf32>
    %11 = vector.multi_reduction <add>, %10, %cst_8 [1] : vector<128x128xf32> to vector<128xf32>
    %c0_9 = arith.constant 0 : index
    %c0_10 = arith.constant 0 : index
    %12 = memref.load %arg5[%c0_9, %c0_10] : memref<1x1xf32, #tpu.memory_space<smem>>
    %13 = vector.broadcast %12 : f32 to vector<128xf32>
    %14 = arith.addf %11, %13 : vector<128xf32>
    %15 = vector.shape_cast %14 : vector<128xf32> to vector<1x128xf32>
    %c0_11 = arith.constant 0 : index
    %c0_12 = arith.constant 0 : index
    %16 = vector.load %arg6[%c0_11, %c0_12] : memref<1x128xf32, #tpu.memory_space<vmem>>, vector<1x128xf32>
    tpu.vector_store %arg6[%c0_11, %c0_12], %15 {strides = array<i32>} : memref<1x128xf32, #tpu.memory_space<vmem>>, vector<1x128xf32>,
    return
  }
  func.func @transform_0(%arg0: i32) -> (i32, i32) {
    %c0_i32 = arith.constant 0 : i32
    %c0_i32_0 = arith.constant 0 : i32
    return %arg0, %c0_i32 : i32, i32
  }
  func.func @transform_1(%arg0: i32) -> (i32, i32) {
    %c0_i32 = arith.constant 0 : i32
    %c0_i32_0 = arith.constant 0 : i32
    %c0_i32_1 = arith.constant 0 : i32
    return %c0_i32, %c0_i32_0 : i32, i32
  }
  func.func @transform_2(%arg0: i32) -> (i32, i32) {
    %c0_i32 = arith.constant 0 : i32
    %c0_i32_0 = arith.constant 0 : i32
    %c0_i32_1 = arith.constant 0 : i32
    return %c0_i32, %c0_i32_0 : i32, i32
  }
  func.func @transform_3(%arg0: i32) -> (i32, i32) {
    %c0_i32 = arith.constant 0 : i32
    %c0_i32_0 = arith.constant 0 : i32
    %c0_i32_1 = arith.constant 0 : i32
    return %c0_i32, %c0_i32_0 : i32, i32
  }
  func.func @transform_4(%arg0: i32) -> (i32, i32) {
    %c0_i32 = arith.constant 0 : i32
    %c0_i32_0 = arith.constant 0 : i32
    %c0_i32_1 = arith.constant 0 : i32
    return %c0_i32, %c0_i32_0 : i32, i32
  }
  func.func @transform_5(%arg0: i32) -> (i32, i32) {
    %c0_i32 = arith.constant 0 : i32
    %c0_i32_0 = arith.constant 0 : i32
    return %arg0, %c0_i32 : i32, i32
  }
}

</mosaic_0001>

<bundles_post_ra>
// kernel: tpu_custom_call.1
= control target key start
LH: loop header
LB: loop body
LE: loop exit
PB: predicated region body
PF: predicated region fallthrough
CT: control target
= control target key end

     0   :  { %vm49_vm0 = vcmask 261120   ;;  %s825_s0 = inlined_call_operand.vmem [shape: f32[128,32], index: 0, kind: input, shape index: {}]   ;;  %s826_s1 = inlined_call_operand.vmem [shape: f32[32,128], index: 1, kind: input, shape index: {}]   ;;  %s827_s2 = inlined_call_operand.vmem [shape: f32[1,128], index: 2, kind: input, shape index: {}]   ;;  %s828_s3 = inlined_call_operand.vmem [shape: f32[1,128], index: 3, kind: input, shape index: {}]   ;;  %s829_s4 = inlined_call_operand.<no memory space> [shape: f32[1,1], index: 4, kind: input, shape index: {}]   ;;  %s830_s5 = inlined_call_operand.hbm [shape: f32[1,128], index: 5, kind: output, shape index: {}]  }
   0x1   :  { %v38_v0 = vld [vmem:[%s826_s1] sm:$0xff]  ;;  %v39_v1 = vld [vmem:[%s826_s1 + $0x8] sm:$0xff]  ;;  %v40_v2 = vld [vmem:[%s826_s1 + $0x10] sm:$0xff] }
   0x2   :  { %v545_v3 = vpack.c.bf16 %v39_v1, %v38_v0  ;;  %v41_v4 = vld [vmem:[%s826_s1 + $0x18] sm:$0xff]  ;;  %v22_v5 = vld [vmem:[%s825_s0] sm:$0xff] }
   0x3   :  { %v30_v6 = vld [vmem:[%s825_s0 + $0x40] sm:$0xff]  ;;  %v549_v7 = vpack.c.bf16 %v41_v4, %v40_v2  ;;  %521 = vmatprep.mubr.msk.f32.mxu0 %vm49_vm0, %v22_v5 }
   0x4   :  { %533 = vmatprep.mubr.msk.f32.mxu1 %vm49_vm0, %v30_v6  ;;  %546 = vmatprep.subr.bf16.mxu0 %v545_v3 }
   0x5   :  { %553 = vmatprep.subr.bf16.mxu1 %v545_v3  ;;  %548 = vmatpush3.bf16.msra.mxu0 %v545_v3 }
   0x6   :  { %555 = vmatpush3.bf16.msra.mxu1 %v545_v3  ;;  %550 = vmatprep.subr.bf16.mxu0 %v549_v7 }
   0x7   :  { %554 = vmatprep.subr.bf16.mxu1 %v549_v7 }
   0x8   :  { %11 = vsyncpa [#allocation4], 0  ;;  %v23_v8 = vld [vmem:[%s825_s0 + $0x8] sm:$0xff]  ;;  %v24_v10 = vld [vmem:[%s825_s0 + $0x10] sm:$0xff]  ;;  %vm359_vm1 = vcmask 130112   ;;  %vm366_vm2 = vcmask 195712  }
   0x9   :  { %552 = vmatpush3.bf16.msra.mxu0 %v549_v7  ;;  %v31_v9 = vld [vmem:[%s825_s0 + $0x48] sm:$0xff]  ;;  %v32_v11 = vld [vmem:[%s825_s0 + $0x50] sm:$0xff]  ;;  %v25_v12 = vld [vmem:[%s825_s0 + $0x18] sm:$0xff]  ;;  %vm373_vm3 = vcmask 261312   ;;  %vm380_vm4 = vcmask 326912   ;;  %vm387_vm5 = vcmask 392512  }
   0xa   :  { %556 = vmatpush3.bf16.msra.mxu1 %v549_v7  ;;  %v33_v13 = vld [vmem:[%s825_s0 + $0x58] sm:$0xff]  ;;  %v26_v14 = vld [vmem:[%s825_s0 + $0x20] sm:$0xff]  ;;  %v27_v16 = vld [vmem:[%s825_s0 + $0x28] sm:$0xff]  ;;  %vm394_vm6 = vcmask 458112   ;;  %vm401_vm7 = vcmask 523712   ;;  %vm408_vm8 = vcmask 589312  }
   0xb   :  { %v34_v15 = vld [vmem:[%s825_s0 + $0x60] sm:$0xff]  ;;  %v35_v17 = vld [vmem:[%s825_s0 + $0x68] sm:$0xff]  ;;  %v28_v18 = vld [vmem:[%s825_s0 + $0x30] sm:$0xff]  ;;  %vm415_vm9 = vcmask 654912   ;;  %vm422_vm10 = vcmask 720512   ;;  %vm429_vm11 = vcmask 786112  }
   0xc   :  { %522 = vmatmul.mubr.msk.f32.vlgmr.msra.gmra.mrb[0].mxu0 %vm49_vm0, %v23_v8  ;;  %v36_v19 = vld [vmem:[%s825_s0 + $0x70] sm:$0xff]  ;;  %v29_v20 = vld [vmem:[%s825_s0 + $0x38] sm:$0xff]  ;;  %v692_v22 = vld [vmem:[%s827_s2] ss:$0 sm:$0xff]  ;;  %vm436_vm12 = vcmask 851712   ;;  %vm443_vm13 = vcmask 917312  }
   0xd   :  { %534 = vmatmul.mubr.msk.f32.vlgmr.msra.gmra.mrb[0].mxu1 %vm49_vm0, %v31_v9  ;;  %524 = vmatprep.mubr.msk.f32.mxu0 %vm49_vm0, %v24_v10  ;;  %v37_v21 = vld [vmem:[%s825_s0 + $0x78] sm:$0xff]  ;;  %v700_v30 = vld [vmem:[%s828_s3] ss:$0 sm:$0xff]  ;;  %vm450_vm14 = vcmask 982912   ;;  %vm457_vm15 = vcmask 1048512  }
   0xe   :  { %536 = vmatprep.mubr.msk.f32.mxu1 %vm49_vm0, %v32_v11 }
  0x10   :  { %525 = vmatmul.mubr.msk.f32.gmra.mrb[2].mxu0 %vm49_vm0, %v25_v12 }
  0x11   :  { %537 = vmatmul.mubr.msk.f32.gmra.mrb[2].mxu1 %vm49_vm0, %v33_v13  ;;  %527 = vmatprep.mubr.msk.f32.mxu0 %vm49_vm0, %v26_v14 }
  0x12   :  { %539 = vmatprep.mubr.msk.f32.mxu1 %vm49_vm0, %v34_v15 }
  0x14   :  { %528 = vmatmul.mubr.msk.f32.gmra.mrb[4].mxu0 %vm49_vm0, %v27_v16 }
  0x15   :  { %540 = vmatmul.mubr.msk.f32.gmra.mrb[4].mxu1 %vm49_vm0, %v35_v17  ;;  %530 = vmatprep.mubr.msk.f32.mxu0 %vm49_vm0, %v28_v18 }
  0x16   :  { %542 = vmatprep.mubr.msk.f32.mxu1 %vm49_vm0, %v36_v19 }
  0x18   :  { %531 = vmatmul.mubr.msk.f32.gmra.mrb[6].mxu0 %vm49_vm0, %v29_v20 }
  0x19   :  { %543 = vmatmul.mubr.msk.f32.gmra.mrb[6].mxu1 %vm49_vm0, %v37_v21 }
  0xdf   :  { %v523_v23 = vpop.f32.mrb[0].mxu0 }
  0xe0   :  { %v535_v24 = vpop.f32.mrb[0].mxu1  ;;  %v170_v25 = vadd.f32 %v523_v23, %v692_v22  ;;  %v164_v27 = vpop.f32.mrb[1].mxu0 }
  0xe1   :  { %v210_v26 = vadd.f32 %v535_v24, %v692_v22  ;;  %v204_v28 = vpop.f32.mrb[1].mxu1  ;;  %v165_v29 = vadd.f32 %v692_v22, %v164_v27 }
  0xe2   :  { %v244_v31 = vmax.f32 %v170_v25, 0.0  ;;  %v205_v34 = vadd.f32 %v692_v22, %v204_v28 }
  0xe3   :  { %v252_v32 = vmax.f32 %v210_v26, 0.0  ;;  %v243_v33 = vmax.f32 %v165_v29, 0.0  ;;  %v526_v35 = vpop.f32.mrb[2].mxu0 }
  0xe4   :  { %v538_v36 = vpop.f32.mrb[2].mxu1  ;;  %v180_v37 = vadd.f32 %v526_v35, %v692_v22  ;;  %v174_v38 = vpop.f32.mrb[3].mxu0  ;;  %v267_v40 = vmul.f32 %v700_v30, %v244_v31  ;;  %v251_v45 = vmax.f32 %v205_v34, 0.0 }
  0xe5   :  { %v275_v39 = vmul.f32 %v700_v30, %v252_v32  ;;  %v220_v41 = vadd.f32 %v538_v36, %v692_v22  ;;  %v214_v42 = vpop.f32.mrb[3].mxu1  ;;  %v175_v48 = vadd.f32 %v692_v22, %v174_v38  ;;  %v266_v51 = vmul.f32 %v700_v30, %v243_v33 }
  0xe6   :  { %v246_v43 = vmax.f32 %v180_v37, 0.0  ;;  %284 = vadd.xlane.f32.xlu0 %v267_v40  ;;  %v215_v49 = vadd.f32 %v692_v22, %v214_v42  ;;  %v274_v61 = vmul.f32 %v700_v30, %v251_v45  ;;  %v741_v33 = vstv %s829_s4  ;;  %s582_s4 = smov [#allocation3]  }
  0xe7   :  { %300 = vadd.xlane.f32.xlu1 %v275_v39  ;;  %v254_v44 = vmax.f32 %v220_v41, 0.0  ;;  %v529_v46 = vpop.f32.mrb[4].mxu0  ;;  %v245_v59 = vmax.f32 %v175_v48, 0.0  ;;  %s467_s9 = sshll.u32 %s582_s4, 4  ;;  %s468_s9 = int_to_ptr.vmem [resolvable:$true] %s467_s9 }
  0xe8   :  { %v541_v47 = vpop.f32.mrb[4].mxu1  ;;  %v269_v50 = vmul.f32 %v700_v30, %v246_v43  ;;  %v184_v52 = vpop.f32.mrb[5].mxu0  ;;  %v190_v54 = vadd.f32 %v529_v46, %v692_v22  ;;  %v253_v60 = vmax.f32 %v215_v49, 0.0  ;;  %s558_s10 = scalar_lea.vmem %s468_s9, 16  ;;  %s562_s11 = scalar_lea.vmem %s468_s9, 32 }
  0xe9   :  { %v224_v53 = vpop.f32.mrb[5].mxu1  ;;  %v277_v55 = vmul.f32 %v700_v30, %v254_v44  ;;  %v185_v56 = vadd.f32 %v692_v22, %v184_v52  ;;  %v268_v4 = vmul.f32 %v700_v30, %v245_v59  ;;  %v230_v6 = vadd.f32 %v541_v47, %v692_v22  ;;  %p559_p0 = scmp.ne.s32.totalorder %s468_s9, %s558_s10  ;;  %p563_p1 = scmp.lt.s32.totalorder %s468_s9, %s468_s9 }
  0xea   :  { %282 = vadd.xlane.f32.xlu0 %v266_v51  ;;  %v248_v0 = vmax.f32 %v190_v54, 0.0  ;;  %v276_v5 = vmul.f32 %v700_v30, %v253_v60  ;;  %v225_v7 = vadd.f32 %v692_v22, %v224_v53  ;;  %p564_p2 = scmp.lt.s32.totalorder %s562_s11, %s558_s10 }
  0xeb   :  { %288 = vadd.xlane.f32.xlu1 %v269_v50  ;;  %v532_v57 = vpop.f32.mrb[6].mxu0  ;;  %v247_v1 = vmax.f32 %v185_v56, 0.0  ;;  %v256_v12 = vmax.f32 %v230_v6, 0.0 }
  0xec   :  { %v544_v58 = vpop.f32.mrb[6].mxu1  ;;  %v194_v62 = vpop.f32.mrb[7].mxu0  ;;  %v200_v2 = vadd.f32 %v532_v57, %v692_v22  ;;  %v271_v10 = vmul.f32 %v700_v30, %v248_v0  ;;  %v255_v14 = vmax.f32 %v225_v7, 0.0  ;;  %p565_p3 = por %p564_p2, %p563_p1 }
  0xed   :  { %v234_v63 = vpop.f32.mrb[7].mxu1  ;;  %v195_v3 = vadd.f32 %v692_v22, %v194_v62  ;;  %v270_v11 = vmul.f32 %v700_v30, %v247_v1  ;;  %v240_v13 = vadd.f32 %v544_v58, %v692_v22  ;;  %v279_v20 = vmul.f32 %v700_v30, %v256_v12 }
  0xee   :  { %298 = vadd.xlane.f32.xlu0 %v274_v61  ;;  %v250_v8 = vmax.f32 %v200_v2, 0.0  ;;  %v235_v15 = vadd.f32 %v692_v22, %v234_v63  ;;  %v278_v21 = vmul.f32 %v700_v30, %v255_v14  ;;  %v348_v22 = vlaneseq  ;;  %p566_p4 = pnand %p565_p3, %p559_p0 }
  0xef   :  { %304 = vadd.xlane.f32.xlu1 %v277_v55  ;;  %v249_v9 = vmax.f32 %v195_v3, 0.0  ;;  %v258_v18 = vmax.f32 %v240_v13, 0.0 }
  0xf0   :  { %v273_v16 = vmul.f32 %v700_v30, %v250_v8  ;;  %v257_v19 = vmax.f32 %v235_v15, 0.0  ;;  %v733_v27 = vand.u32 127, %v348_v22  ;;  %v735_v31 = vshrl.u32 %v348_v22, 7 }
  0xf1   :  { %v272_v17 = vmul.f32 %v700_v30, %v249_v9  ;;  %v281_v23 = vmul.f32 %v700_v30, %v258_v18 }
  0xf2   :  { %302 = vadd.xlane.f32.xlu0 %v276_v5  ;;  %v280_v24 = vmul.f32 %v700_v30, %v257_v19  ;;  %v354_v32 = vadd.s32 4294967288, %v733_v27  ;;  %v361_v30 = vadd.s32 4294967280, %v733_v27  ;;  %v352_v34 = vsub.s32 %v733_v27, %v735_v31 }
  0xf3   :  { %286 = vadd.xlane.f32.xlu1 %v268_v4  ;;  %v750_v38 = vadd.s32 4294967224, %v733_v27  ;;  %v368_v39 = vadd.s32 4294967272, %v733_v27  ;;  %v756_v42 = vadd.s32 4294967232, %v733_v27  ;;  %v375_v44 = vadd.s32 4294967264, %v733_v27 }
  0xf4   :  { %v357_v40 = vsub.s32 %v354_v32, %v735_v31  ;;  %v364_v43 = vsub.s32 %v361_v30, %v735_v31  ;;  %v761_v46 = vadd.s32 4294967208, %v733_v27  ;;  %v764_v48 = vadd.s32 4294967216, %v733_v27 }
  0xf5   :  { %v382_v50 = vadd.s32 4294967256, %v733_v27  ;;  %v413_v51 = vsub.s32 %v750_v38, %v735_v31  ;;  %v371_v52 = vsub.s32 %v368_v39, %v735_v31  ;;  %v396_v56 = vadd.s32 4294967240, %v733_v27 }
  0xf6   :  { %290 = vadd.xlane.f32.xlu0 %v270_v11  ;;  %v406_v57 = vsub.s32 %v756_v42, %v735_v31  ;;  %v378_v59 = vsub.s32 %v375_v44, %v735_v31  ;;  %v389_v60 = vadd.s32 4294967248, %v733_v27  ;;  %v427_v62 = vsub.s32 %v761_v46, %v735_v31 }
  0xf7   :  { %292 = vadd.xlane.f32.xlu1 %v271_v10  ;;  %v420_v63 = vsub.s32 %v764_v48, %v735_v31  ;;  %v385_v0 = vsub.s32 %v382_v50, %v735_v31  ;;  %v399_v7 = vsub.s32 %v396_v56, %v735_v31  ;;  %v438_v8 = vadd.s32 4294967192, %v733_v27 }
  0xf8   :  { %v392_v10 = vsub.s32 %v389_v60, %v735_v31  ;;  %v431_v15 = vadd.s32 4294967200, %v733_v27 }
  0xfa   :  { %294 = vadd.xlane.f32.xlu0 %v272_v17 }
  0xfb   :  { %296 = vadd.xlane.f32.xlu1 %v273_v16 }
  0xfe   :  { %306 = vadd.xlane.f32.xlu0 %v278_v21  ;;  %v441_v21 = vsub.s32 %v438_v8, %v735_v31 }
  0xff   :  { %308 = vadd.xlane.f32.xlu1 %v279_v20 }
 0x102   :  { %310 = vadd.xlane.f32.xlu0 %v280_v24 }
 0x103   :  { %312 = vadd.xlane.f32.xlu1 %v281_v23  ;;  %v452_v23 = vadd.s32 4294967176, %v733_v27 }
 0x105   :  { %v455_v42 = vsub.s32 %v452_v23, %v735_v31 }
 0x173   :  { %v285_v26 = vpop.xlane.xlu0 %284 }
 0x174   :  { %v731_v25 = vpop.xlane.xlu1 %300  ;;  %v317_v41 = vadd.f32 %v741_v33, %v285_v26 }
 0x175   :  { %v325_v20 = vadd.f32 %v741_v33, %v731_v25  ;;  %v434_v25 = vsub.s32 %v431_v15, %v735_v31 }
 0x176   :  { %v358_v54 = vrot.slane %v317_v41, %v357_v40 }
 0x177   :  { %v283_v29 = vpop.xlane.xlu0 %282  ;;  %v414_v39 = vrot.slane %v325_v20, %v413_v51 }
 0x178   :  { %v289_v28 = vpop.xlane.xlu1 %288  ;;  %v316_v35 = vadd.f32 %v741_v33, %v283_v29 }
 0x179   :  { %v319_v55 = vadd.f32 %v741_v33, %v289_v28  ;;  %v445_v28 = vadd.s32 4294967184, %v733_v27 }
 0x17a   :  { %v353_v45 = vrot.slane %v316_v35, %v352_v34 }
 0x17b   :  { %v299_v37 = vpop.xlane.xlu0 %298  ;;  %v372_v6 = vrot.slane %v319_v55, %v371_v52 }
 0x17c   :  { %v747_v36 = vpop.xlane.xlu1 %304  ;;  %v360_v61 = vsel %vm359_vm1, %v358_v54, %v353_v45  ;;  %v324_v16 = vadd.f32 %v741_v33, %v299_v37 }
 0x17d   :  { %v327_v29 = vadd.f32 %v741_v33, %v747_v36 }
 0x17e   :  { %v407_v35 = vrot.slane %v324_v16, %v406_v57 }
 0x17f   :  { %v303_v49 = vpop.xlane.xlu0 %302  ;;  %v428_v44 = vrot.slane %v327_v29, %v427_v62 }
 0x180   :  { %v287_v47 = vpop.xlane.xlu1 %286  ;;  %v326_v24 = vadd.f32 %v741_v33, %v303_v49 }
 0x181   :  { %v318_v53 = vadd.f32 %v741_v33, %v287_v47 }
 0x182   :  { %v421_v36 = vrot.slane %v326_v24, %v420_v63 }
 0x183   :  { %v365_v58 = vrot.slane %v318_v53, %v364_v43  ;;  %v291_v2 = vpop.xlane.xlu0 %290  ;;  %v448_v43 = vsub.s32 %v445_v28, %v735_v31 }
 0x184   :  { %v293_v1 = vpop.xlane.xlu1 %292  ;;  %v320_v5 = vadd.f32 %v741_v33, %v291_v2 }
 0x185   :  { %v367_v3 = vsel %vm366_vm2, %v365_v58, %v360_v61  ;;  %v321_v4 = vadd.f32 %v741_v33, %v293_v1 }
 0x186   :  { %v379_v9 = vrot.slane %v320_v5, %v378_v59  ;;  %v374_v12 = vsel %vm373_vm3, %v372_v6, %v367_v3 }
 0x187   :  { %v386_v11 = vrot.slane %v321_v4, %v385_v0  ;;  %v295_v14 = vpop.xlane.xlu0 %294 }
 0x188   :  { %v297_v13 = vpop.xlane.xlu1 %296  ;;  %v381_v17 = vsel %vm380_vm4, %v379_v9, %v374_v12  ;;  %v322_v19 = vadd.f32 %v741_v33, %v295_v14 }
 0x189   :  { %v323_v18 = vadd.f32 %v741_v33, %v297_v13  ;;  %v388_v32 = vsel %vm387_vm5, %v386_v11, %v381_v17 }
 0x18a   :  { %v393_v26 = vrot.slane %v322_v19, %v392_v10 }
 0x18b   :  { %v400_v22 = vrot.slane %v323_v18, %v399_v7  ;;  %v307_v34 = vpop.xlane.xlu0 %306 }
 0x18c   :  { %v309_v30 = vpop.xlane.xlu1 %308  ;;  %v395_v37 = vsel %vm394_vm6, %v393_v26, %v388_v32  ;;  %v328_v38 = vadd.f32 %v741_v33, %v307_v34 }
 0x18d   :  { %v402_v40 = vsel %vm401_vm7, %v400_v22, %v395_v37  ;;  %v329_v27 = vadd.f32 %v741_v33, %v309_v30 }
 0x18e   :  { %v409_v41 = vsel %vm408_vm8, %v407_v35, %v402_v40  ;;  %v435_v49 = vrot.slane %v328_v38, %v434_v25 }
 0x18f   :  { %v416_v45 = vsel %vm415_vm9, %v414_v39, %v409_v41  ;;  %v311_v47 = vpop.xlane.xlu0 %310  ;;  %v442_v52 = vrot.slane %v329_v27, %v441_v21 }
 0x190   :  { %v313_v46 = vpop.xlane.xlu1 %312  ;;  %v423_v48 = vsel %vm422_vm10, %v421_v36, %v416_v45  ;;  %v330_v51 = vadd.f32 %v741_v33, %v311_v47 }
 0x191   :  { %v331_v50 = vadd.f32 %v741_v33, %v313_v46  ;;  %v430_v53 = vsel %vm429_vm11, %v428_v44, %v423_v48 }
 0x192   :  { %v437_v31 = vsel %vm436_vm12, %v435_v49, %v430_v53  ;;  %v449_v55 = vrot.slane %v330_v51, %v448_v43 }
 0x193   :  { %v456_v54 = vrot.slane %v331_v50, %v455_v42  ;;  %v444_v56 = vsel %vm443_vm13, %v442_v52, %v437_v31 }
 0x194   :  { %v451_v57 = vsel %vm450_vm14, %v449_v55, %v444_v56 }
 0x195   :  { %v458_v58 = vsel %vm457_vm15, %v456_v54, %v451_v57 }
 0x196   :  { %460 = vst [vmem:[#allocation3] sm:$0x1] %v458_v58 }
 0x197   :  { %569 = shalt.err (!%p566_p4)
}
 0x198   :  { %s570_s14 = scalar_lea.hbm %s830_s5, 16 }
 0x199   :  { %p571_p5 = scmp.ne.s32.totalorder %s830_s5, %s570_s14  ;;  %p574_p6 = scmp.lt.u32.totalorder %s570_s14, %s830_s5 }
 0x19b   :  { %p576_p7 = pnand %p574_p6, %p571_p5 }
 0x19d   :  { %579 = shalt.err (!%p576_p7)
}
 0x19e   :  { %470 = dma.vmem_to_hbm [thread:$0]  %s468_s9, 16, %s830_s5, [#allocation4]  }
 0x19f   :  { %580 = dma.done.wait [#allocation4], 16  }
 0x1a0   :  { %581 = vsyncadd [#allocation4], 4294967280 }
 0x1a1   :  { %474 = vsyncpa [#allocation4], 1 }

</bundles_post_ra>
